<compile_context>
chip_gen: v5e
topology: v5e:2x2
jax: 0.10.0
libtpu: 0.0.40
codegen_flags: <defaults>
</compile_context>

<pallas_src>
import functools

import jax
import jax.numpy as jnp
import numpy as np
from jax.experimental import pallas as pl
from jax.experimental.pallas import tpu as pltpu


# ---------------------------------------------------------------------------
# Kernels
# ---------------------------------------------------------------------------

def _linear_from_acc(acc_ref, w_ref, b_ref):
    # (TQ, F_in) @ (F_in, F_out) + (1, F_out)   -- runs once per row tile.
    return (jnp.dot(acc_ref[...], w_ref[...],
                    preferred_element_type=jnp.float32) + b_ref[...])


def gcn_kernel(adj_ref, x_ref, w_ref, b_ref, out_ref, acc_ref):
    """Fused (adj @ x) @ W + b, no residual."""
    k = pl.program_id(1)

    @pl.when(k == 0)
    def _init():
        acc_ref[...] = jnp.zeros_like(acc_ref)

    # accumulate one (TQ, TK) x (TK, F_in) slab of the spmm on the MXU
    acc_ref[...] += jnp.dot(adj_ref[...], x_ref[...],
                            preferred_element_type=jnp.float32)

    @pl.when(k == pl.num_programs(1) - 1)
    def _finalize():
        out_ref[...] = _linear_from_acc(acc_ref, w_ref, b_ref).astype(out_ref.dtype)


def gcn_res_kernel(adj_ref, x_ref, w_ref, b_ref, resid_ref, out_ref, acc_ref):
    """Fused (adj @ x) @ W + b with residual: relu(out) + resid."""
    k = pl.program_id(1)

    @pl.when(k == 0)
    def _init():
        acc_ref[...] = jnp.zeros_like(acc_ref)

    acc_ref[...] += jnp.dot(adj_ref[...], x_ref[...],
                            preferred_element_type=jnp.float32)

    @pl.when(k == pl.num_programs(1) - 1)
    def _finalize():
        out = _linear_from_acc(acc_ref, w_ref, b_ref)
        out_ref[...] = (jnp.maximum(out, 0.0) + resid_ref[...]).astype(out_ref.dtype)


def affine_kernel(x_ref, w_ref, b_ref, out_ref):
    """Row-tiled x @ W + b (used for the different-width residual projection)."""
    out_ref[...] = (jnp.dot(x_ref[...], w_ref[...],
                            preferred_element_type=jnp.float32)
                    + b_ref[...]).astype(out_ref.dtype)


# ---------------------------------------------------------------------------
# Wrappers
# ---------------------------------------------------------------------------

def _pick_tile(n, block):
    return block if n % block == 0 else n


def gcn_layer_call(adj, x, w, b, residual=None, *, block_q=128, block_k=128):
    """One GCNLayer forward: (adj @ x) @ w + b  (+ relu/residual if given)."""
    n = adj.shape[0]
    f_in = x.shape[1]
    f_out = w.shape[1]
    tq = _pick_tile(n, block_q)
    tk = _pick_tile(n, block_k)
    grid = (n // tq, n // tk)

    in_specs = [
        pl.BlockSpec((tq, tk), lambda i, k: (i, k)),       # adj tile
        pl.BlockSpec((tk, f_in), lambda i, k: (k, 0)),     # x tile (reduction)
        pl.BlockSpec((f_in, f_out), lambda i, k: (0, 0)),  # W (resident)
        pl.BlockSpec((1, f_out), lambda i, k: (0, 0)),     # b (resident)
    ]
    args = [adj.astype(jnp.float32), x.astype(jnp.float32),
            w.astype(jnp.float32), b.reshape(1, f_out).astype(jnp.float32)]

    if residual is not None:
        in_specs.append(pl.BlockSpec((tq, f_out), lambda i, k: (i, 0)))
        args.append(residual.astype(jnp.float32))
        kernel = gcn_res_kernel
    else:
        kernel = gcn_kernel

    return pl.pallas_call(
        kernel,
        out_shape=jax.ShapeDtypeStruct((n, f_out), jnp.float32),
        grid_spec=pltpu.PrefetchScalarGridSpec(
            num_scalar_prefetch=0,
            grid=grid,
            in_specs=in_specs,
            out_specs=pl.BlockSpec((tq, f_out), lambda i, k: (i, 0)),
            scratch_shapes=[pltpu.VMEM((tq, f_in), jnp.float32)],
        ),
        compiler_params=pltpu.CompilerParams(
            dimension_semantics=("parallel", "arbitrary")),
    )(*args)


def affine_call(x, w, b, *, block=128):
    """Row-tiled dense x @ w + b (residual projection when widths differ)."""
    n, f_in = x.shape
    f_out = w.shape[1]
    t = _pick_tile(n, block)
    return pl.pallas_call(
        affine_kernel,
        out_shape=jax.ShapeDtypeStruct((n, f_out), jnp.float32),
        grid_spec=pltpu.PrefetchScalarGridSpec(
            num_scalar_prefetch=0,
            grid=(n // t,),
            in_specs=[pl.BlockSpec((t, f_in), lambda i: (i, 0)),
                      pl.BlockSpec((f_in, f_out), lambda i: (0, 0)),
                      pl.BlockSpec((1, f_out), lambda i: (0, 0))],
            out_specs=pl.BlockSpec((t, f_out), lambda i: (i, 0)),
        ),
        compiler_params=pltpu.CompilerParams(dimension_semantics=("parallel",)),
    )(x.astype(jnp.float32), w.astype(jnp.float32),
      b.reshape(1, f_out).astype(jnp.float32))


def gcn_layer_forward(params, adj, x, last_hidden, res_connection):
    """Matches GCNLayer.forward(input_feature, last_hidden)."""
    w, b = params["w"], params["b"]
    if res_connection and last_hidden is not None:
        if last_hidden.shape[1] != w.shape[1]:
            resid = affine_call(last_hidden, params["w_res"], params["b_res"])
        else:
            resid = last_hidden
        return gcn_layer_call(adj, x, w, b, residual=resid)
    return gcn_layer_call(adj, x, w, b)


def multiple_gcn_forward(params_list, adj, x, res_connection):
    """Matches MutipleGCN.forward(x) in eval mode."""
    if len(params_list) == 1:
        return gcn_layer_forward(params_list[0], adj, x, None, res_connection)
    last_hidden = None
    for p in params_list[:-1]:
        x = gcn_layer_forward(p, adj, x, last_hidden, res_connection)
        last_hidden = x
        # TODO(synk): F.dropout(x, rate, training) skipped (eval mode -> identity).
    return gcn_layer_forward(params_list[-1], adj, x, None, res_connection)


# ---------------------------------------------------------------------------
# Parameter construction (mirrors MutipleGCN.init_layers / init_weights)
# ---------------------------------------------------------------------------

def _xavier_uniform(key, shape):
    fan_in, fan_out = shape
    limit = float(np.sqrt(6.0 / (fan_in + fan_out)))
    return jax.random.uniform(key, shape, jnp.float32, -limit, limit)


def _init_gcn_layer(key, in_dims, out_dims):
    kw, kb, krw, krb = jax.random.split(key, 4)
    bound = 1.0 / float(np.sqrt(in_dims))
    return dict(
        w=_xavier_uniform(kw, (in_dims, out_dims)),      # stored as [in, out]
        b=jax.random.uniform(kb, (out_dims,), jnp.float32, -bound, bound),
        w_res=_xavier_uniform(krw, (in_dims, out_dims)),
        b_res=jax.random.uniform(krb, (out_dims,), jnp.float32, -bound, bound),
    )


def _layer_dims(ngcu, nfeat, nhid, nclass):
    if ngcu == 1:
        return [(nfeat, nclass)]
    if ngcu == 2:
        return [(nfeat, nhid), (nhid, nclass)]
    return [(nfeat, nhid)] + [(nhid, nhid)] * (ngcu - 2) + [(nhid, nclass)]


# ---------------------------------------------------------------------------
# Pure-JAX reference (mirrors the PyTorch forward, eval mode)
# ---------------------------------------------------------------------------

def _reference(params_list, adj, x, res_connection):
    def layer(p, x, last_hidden):
        out = adj @ x
        out = out @ p["w"] + p["b"]
        if res_connection and last_hidden is not None:
            if last_hidden.shape[1] != out.shape[1]:
                out = jnp.maximum(out, 0.0) + (last_hidden @ p["w_res"] + p["b_res"])
            else:
                out = jnp.maximum(out, 0.0) + last_hidden
        return out

    if len(params_list) == 1:
        return layer(params_list[0], x, None)
    last_hidden = None
    for p in params_list[:-1]:
        x = layer(p, x, last_hidden)
        last_hidden = x
    return layer(params_list[-1], x, None)


# ---------------------------------------------------------------------------
# Demo / self-test
# ---------------------------------------------------------------------------

if __name__ == "__main__":
    N, nfeat, nhid, nclass = 256, 32, 64, 16
    ngcu = 3
    res_connection = True

    key = jax.random.PRNGKey(0)
    k_adj, k_x, k_layers = jax.random.split(key, 3)

    # Random sparse graph with self-loops, row-normalized (typical GCN adj).
    mask = jax.random.bernoulli(k_adj, 0.05, (N, N)).astype(jnp.float32)
    mask = jnp.maximum(mask, jnp.eye(N, dtype=jnp.float32))
    adj = mask / mask.sum(axis=1, keepdims=True)

    x = jax.random.normal(k_x, (N, nfeat), jnp.float32)

    dims = _layer_dims(ngcu, nfeat, nhid, nclass)
    layer_keys = jax.random.split(k_layers, len(dims))
    params_list = [_init_gcn_layer(k, di, do) for k, (di, do) in zip(layer_keys, dims)]

    out = multiple_gcn_forward(params_list, adj, x, res_connection)
    out = jax.block_until_ready(out)

    ref = _reference(params_list, adj, x, res_connection)
    np.testing.assert_allclose(np.asarray(out), np.asarray(ref),
                               rtol=2e-4, atol=2e-4)
    print("KERNEL_OK")
</pallas_src>

<mosaic_0001>
module attributes {stable_mosaic.version = 11 : i64} {
  func.func @gcn_kernel(%arg0: i32, %arg1: i32, %arg2: memref<128x128xf32, #tpu.memory_space<vmem>>, %arg3: memref<128x32xf32, #tpu.memory_space<vmem>>, %arg4: memref<32x64xf32, #tpu.memory_space<vmem>>, %arg5: memref<1x64xf32, #tpu.memory_space<vmem>>, %arg6: memref<128x64xf32, #tpu.memory_space<vmem>>, %arg7: memref<128x32xf32, #tpu.memory_space<vmem>>) attributes {dimension_semantics = [#tpu.dimension_semantics<parallel>, #tpu.dimension_semantics<arbitrary>], iteration_bounds = array<i64: 2, 2>, scalar_prefetch = 0 : i64, scratch_operands = 1 : i64, tpu.core_type = #tpu.core_type<tc>, window_params = [{transform_indices = @transform_0, window_bounds = array<i64: 128, 128>}, {transform_indices = @transform_1, window_bounds = array<i64: 128, 32>}, {pipeline_mode = #tpu.pipeline_mode<synchronous>, transform_indices = @transform_2, window_bounds = array<i64: 32, 64>}, {pipeline_mode = #tpu.pipeline_mode<synchronous>, transform_indices = @transform_3, window_bounds = array<i64: 1, 64>}, {transform_indices = @transform_4, window_bounds = array<i64: 128, 64>}]} {
    %c0_i32 = arith.constant 0 : i32
    %0 = arith.cmpi eq, %arg1, %c0_i32 : i32
    %1 = arith.extui %0 : i1 to i32
    %c0_i32_0 = arith.constant 0 : i32
    %2 = arith.cmpi ne, %1, %c0_i32_0 : i32
    scf.if %2 {
      %cst_9 = arith.constant 0.000000e+00 : f32
      %12 = vector.broadcast %cst_9 : f32 to vector<128x32xf32>
      %c0_10 = arith.constant 0 : index
      %c0_11 = arith.constant 0 : index
      %13 = vector.load %arg7[%c0_10, %c0_11] : memref<128x32xf32, #tpu.memory_space<vmem>>, vector<128x32xf32>
      tpu.vector_store %arg7[%c0_10, %c0_11], %12 {strides = array<i32>} : memref<128x32xf32, #tpu.memory_space<vmem>>, vector<128x32xf32>,
    } else {
    }
    %c0 = arith.constant 0 : index
    %c0_1 = arith.constant 0 : index
    %3 = vector.load %arg7[%c0, %c0_1] : memref<128x32xf32, #tpu.memory_space<vmem>>, vector<128x32xf32>
    %c0_2 = arith.constant 0 : index
    %c0_3 = arith.constant 0 : index
    %4 = vector.load %arg2[%c0_2, %c0_3] : memref<128x128xf32, #tpu.memory_space<vmem>>, vector<128x128xf32>
    %c0_4 = arith.constant 0 : index
    %c0_5 = arith.constant 0 : index
    %5 = vector.load %arg3[%c0_4, %c0_5] : memref<128x32xf32, #tpu.memory_space<vmem>>, vector<128x32xf32>
    %cst = arith.constant dense<0.000000e+00> : vector<128x32xf32>
    %6 = tpu.matmul %4, %5, %cst {dimension_numbers = #tpu.dot_dimension_numbers<[1], [0], [0], [1], [0, 0, 1, 1], [], []>} : vector<128x128xf32>, vector<128x32xf32>, vector<128x32xf32> -> vector<128x32xf32>
    %7 = arith.addf %3, %6 : vector<128x32xf32>
    %c0_6 = arith.constant 0 : index
    %c0_7 = arith.constant 0 : index
    %8 = vector.load %arg7[%c0_6, %c0_7] : memref<128x32xf32, #tpu.memory_space<vmem>>, vector<128x32xf32>
    tpu.vector_store %arg7[%c0_6, %c0_7], %7 {strides = array<i32>} : memref<128x32xf32, #tpu.memory_space<vmem>>, vector<128x32xf32>,
    %c1_i32 = arith.constant 1 : i32
    %9 = arith.cmpi eq, %arg1, %c1_i32 : i32
    %10 = arith.extui %9 : i1 to i32
    %c0_i32_8 = arith.constant 0 : i32
    %11 = arith.cmpi ne, %10, %c0_i32_8 : i32
    scf.if %11 {
      %c0_9 = arith.constant 0 : index
      %c0_10 = arith.constant 0 : index
      %12 = vector.load %arg7[%c0_9, %c0_10] : memref<128x32xf32, #tpu.memory_space<vmem>>, vector<128x32xf32>
      %c0_11 = arith.constant 0 : index
      %c0_12 = arith.constant 0 : index
      %13 = vector.load %arg4[%c0_11, %c0_12] : memref<32x64xf32, #tpu.memory_space<vmem>>, vector<32x64xf32>
      %cst_13 = arith.constant dense<0.000000e+00> : vector<128x64xf32>
      %14 = tpu.matmul %12, %13, %cst_13 {dimension_numbers = #tpu.dot_dimension_numbers<[1], [0], [0], [1], [0, 0, 1, 1], [], []>} : vector<128x32xf32>, vector<32x64xf32>, vector<128x64xf32> -> vector<128x64xf32>
      %c0_14 = arith.constant 0 : index
      %c0_15 = arith.constant 0 : index
      %15 = vector.load %arg5[%c0_14, %c0_15] : memref<1x64xf32, #tpu.memory_space<vmem>>, vector<1x64xf32>
      %16 = vector.broadcast %15 : vector<1x64xf32> to vector<128x64xf32>
      %17 = arith.addf %14, %16 : vector<128x64xf32>
      %c0_16 = arith.constant 0 : index
      %c0_17 = arith.constant 0 : index
      %18 = vector.load %arg6[%c0_16, %c0_17] : memref<128x64xf32, #tpu.memory_space<vmem>>, vector<128x64xf32>
      tpu.vector_store %arg6[%c0_16, %c0_17], %17 {strides = array<i32>} : memref<128x64xf32, #tpu.memory_space<vmem>>, vector<128x64xf32>,
    } else {
    }
    return
  }
  func.func @transform_0(%arg0: i32, %arg1: i32) -> (i32, i32) {
    %c0_i32 = arith.constant 0 : i32
    return %arg0, %arg1 : i32, i32
  }
  func.func @transform_1(%arg0: i32, %arg1: i32) -> (i32, i32) {
    %c0_i32 = arith.constant 0 : i32
    %c0_i32_0 = arith.constant 0 : i32
    return %arg1, %c0_i32 : i32, i32
  }
  func.func @transform_2(%arg0: i32, %arg1: i32) -> (i32, i32) {
    %c0_i32 = arith.constant 0 : i32
    %c0_i32_0 = arith.constant 0 : i32
    %c0_i32_1 = arith.constant 0 : i32
    return %c0_i32, %c0_i32_0 : i32, i32
  }
  func.func @transform_3(%arg0: i32, %arg1: i32) -> (i32, i32) {
    %c0_i32 = arith.constant 0 : i32
    %c0_i32_0 = arith.constant 0 : i32
    %c0_i32_1 = arith.constant 0 : i32
    return %c0_i32, %c0_i32_0 : i32, i32
  }
  func.func @transform_4(%arg0: i32, %arg1: i32) -> (i32, i32) {
    %c0_i32 = arith.constant 0 : i32
    %c0_i32_0 = arith.constant 0 : i32
    return %arg0, %c0_i32 : i32, i32
  }
}

</mosaic_0001>

<bundles_post_ra>
// kernel: tpu_custom_call.1
= control target key start
LH: loop header
LB: loop body
LE: loop exit
PB: predicated region body
PF: predicated region fallthrough
CT: control target
= control target key end

     0   :  { %9 = vsyncpa [#allocation4], 0  ;;  %s1227_s0 = inlined_call_operand.hbm [shape: f32[256,256], index: 0, kind: input, shape index: {}]   ;;  %s1228_s1 = inlined_call_operand.vmem [shape: f32[256,32], index: 1, kind: input, shape index: {}]   ;;  %s1229_s2 = inlined_call_operand.vmem [shape: f32[32,64], index: 2, kind: input, shape index: {}]   ;;  %s1230_s3 = inlined_call_operand.vmem [shape: f32[1,64], index: 3, kind: input, shape index: {}]   ;;  %s1231_s4 = inlined_call_operand.vmem [shape: f32[256,64], index: 4, kind: output, shape index: {}]  }
   0x1   :  { %11 = vsyncpa [#allocation4 + $0x1], 0  ;;  %s976_s15 = smov 0   ;;  %s978_s16 = smov 0  }
   0x2   :  { %s980_s17 = smov 0   ;;  %s982_s18 = smov 0  }
   0x3   :  { %s984_s19 = smov 0   ;;  %s986_s20 = smov 0  }
   0x4   :  { %s988_s21 = smov 0   ;;  %s990_s22 = smov 0  }
   0x5 LB: > { %s678_s23 = sadd.s32 4294967295, %s945_s22   ;;  %s26_s24 = sadd.s32 1, %s937_s20  ;;  %s945_s22 = sphi %s990_s22, %s17_s22   ;;  %s941_s21 = sphi %s988_s21, %s1243_s21   ;;  %s937_s20 = sphi %s986_s20, %s1242_s20   ;;  %s933_s19 = sphi %s984_s19, %s1241_s19   ;;  %s929_s18 = sphi %s982_s18, %s1240_s18   ;;  %s925_s17 = sphi %s980_s17, %s1239_s17   ;;  %s921_s16 = sphi %s978_s16, %s1238_s16   ;;  %s917_s15 = sphi %s976_s15, %s1237_s15  }
   0x6   : > { %p27_p0 = scmp.ge.s32.totalorder %s26_s24, 2  ;;  %s29_s25 = sadd.s32 1, %s941_s21 }
   0x7   : > { %s38_s26 = sadd.s32 1, %s925_s17  ;;  %p45_p1 = scmp.ne.s32.totalorder %s925_s17, %s921_s16 }
   0x8   : > { %s1245_s24 = smov (%p27_p0, %s26_s24), 0  ;;  %s1247_s25 = smov (!%p27_p0, %s29_s25), %s941_s21 }
   0x9   : > { %s34_s27 = ssub.s32 %s937_s20, %s1245_s24  ;;  %p46_p2 = scmp.eq.s32.totalorder %s945_s22, 0 }
   0xa   : > { %p31_p3 = scmp.ge.s32.totalorder %s1247_s25, 2  ;;  %p51_p4 = scmp.ne.s32.totalorder %s921_s16, %s917_s15 }
   0xb   : > { %p1027_p5 = por %p46_p2, %p45_p1  ;;  %p52_p6 = scmp.eq.s32.totalorder %s678_s23, 0 }
   0xc   : > { %s1249_s25 = smov (%p31_p3, %s1247_s25), 0  ;;  %p779_p8 = scmp.lt.s32.totalorder %s945_s22, 4 }
   0xd   : > { %1234 = sst [smem:[#allocation6_spill]] %s1249_s25  ;;  %p1033_p7 = por %p52_p6, %p51_p4 }
   0xe   : > { %s33_s30 = ssub.s32 %s941_s21, %s1249_s25  ;;  %s175_s6 = sand.u32 1, %s925_s17  }
   0xf   : > { %s35_s5 = sor.u32 %s34_s27, %s33_s30  ;;  %s682_s7 = sshll.u32 %s175_s6, 7 }
  0x10   : > { %p36_p9 = scmp.eq.s32.totalorder %s35_s5, 0  ;;  %s712_s8 = sshll.u32 %s941_s21, 5 }
  0x11   : > { %s184_s10 = sadd.s32 %s937_s20, %s712_s8  ;;  %s179_s12 = scalar_lea.vmem [#allocation3], %s682_s7 }
  0x12   : > { %s1043_s9 = scalar_select %p36_p9, %s925_s17, %s38_s26  }
  0x13   : > { %s685_s11 = sshll.u32 %s184_s10, 3  ;;  %s189_s13 = sshll.u32 %s179_s12, 4  ;;  %s190_s13 = int_to_ptr.vmem [resolvable:$true] %s189_s13 }
  0x14   : > { %s186_s23 = scalar_lea.hbm %s1227_s0, %s685_s11  ;;  %p776_p10 = pnand %p779_p8, %p1027_p5 }
  0x15   : > { %s187_s25 = sshll.u32 %s186_s23, 4  ;;  %p686_p11 = scmp.ge.s32.totalorder %s945_s22, 1  ;;  %s188_s25 = int_to_ptr.hbm [resolvable:$true] %s187_s25 }
  0x16   : > { %s176_s27 = scalar_lea.sflag [#allocation4], %s175_s6  ;;  %s947_s30 = smov 256  }
  0x17   : > { %s948_s26 = smov 128   ;;  %s949_s5 = smov 8  }
  0x18   : > { %778 = dma.hbm_to_vmem [thread:$0]  (!%p776_p10), %s188_s25, 2048, %s190_s13, %s176_s27, %s947_s30, %s948_s26, %s949_s5  }
  0x19   : > { %p206_p12 = scmp.lt.s32.totalorder %s945_s22, 5 }
  0x1b   : > { %p207_p13 = pnand %p686_p11, %p206_p12 }
  0x1c   : > { %s212_s7 = sand.u32 (!%p207_p13), 1, %s921_s16  }
  0x1d   : > { %210 = sbr.rel (%p207_p13) target bundleno = 423 (0x1a7), region = 36  ;;  %s687_s8 = sshll.u32 (!%p207_p13), %s212_s7, 7 }
  0x1e   : > { %s213_s10 = scalar_lea.sflag (!%p207_p13), [#allocation4], %s212_s7  ;;  %s1056_s11 = scalar_lea.vmem (!%p207_p13), [#allocation3], %s687_s8 }
  0x22   : > { %912 = dma.done.wait (%p1033_p7), %s213_s10, 2048  }
  0x23   : > { %914 = vsyncadd (%p1033_p7), %s213_s10, 4294965248  ;;  %s688_s28 = sshll.u32 %s929_s18, 4  ;;  %s690_s6 = sshll.u32 %s933_s19, 4 }
  0x24   : > { %p249_p0 = scmp.lt.s32.totalorder %s688_s28, 31  ;;  %p255_p1 = scmp.lt.s32.totalorder %s690_s6, 31 }
  0x25   : > { %p692_p2 = scmp.ne.s32.totalorder %s929_s18, 0 }
  0x26   : > { %s1251_s28 = smov (!%p249_p0, %s688_s28), 31  ;;  %s1253_s6 = smov (!%p255_p1, %s690_s6), 31 }
  0x27   : > { %s689_s25 = sshll.u32 %s1251_s28, 3  ;;  %s691_s15 = sshll.u32 %s1253_s6, 3 }
  0x28   : > { %s1067_s14 = scalar_lea.vmem %s1228_s1, %s689_s25  ;;  %s1072_s29 = scalar_lea.vmem %s1231_s4, %s691_s15 }
  0x29   : > { %263 = sbr.rel (%p692_p2) target bundleno = 63 (0x3f), region = 44 }
  0x2e   : > { %vm264_vm0 = vcmask 261120   ;;  %v950_v0 = vmov 0.0  }
  0x2f   : > { %265 = vst.msk [vmem:[#allocation2] sm:$0xff] %vm264_vm0, %v950_v0 }
  0x30   : > { %266 = vst.msk [vmem:[#allocation2 + $0x8] sm:$0xff] %vm264_vm0, %v950_v0 }
  0x31   : > { %267 = vst.msk [vmem:[#allocation2 + $0x10] sm:$0xff] %vm264_vm0, %v950_v0 }
  0x32   : > { %268 = vst.msk [vmem:[#allocation2 + $0x18] sm:$0xff] %vm264_vm0, %v950_v0 }
  0x33   : > { %269 = vst.msk [vmem:[#allocation2 + $0x20] sm:$0xff] %vm264_vm0, %v950_v0 }
  0x34   : > { %270 = vst.msk [vmem:[#allocation2 + $0x28] sm:$0xff] %vm264_vm0, %v950_v0 }
  0x35   : > { %271 = vst.msk [vmem:[#allocation2 + $0x30] sm:$0xff] %vm264_vm0, %v950_v0 }
  0x36   : > { %272 = vst.msk [vmem:[#allocation2 + $0x38] sm:$0xff] %vm264_vm0, %v950_v0 }
  0x37   : > { %273 = vst.msk [vmem:[#allocation2 + $0x40] sm:$0xff] %vm264_vm0, %v950_v0 }
  0x38   : > { %274 = vst.msk [vmem:[#allocation2 + $0x48] sm:$0xff] %vm264_vm0, %v950_v0 }
  0x39   : > { %275 = vst.msk [vmem:[#allocation2 + $0x50] sm:$0xff] %vm264_vm0, %v950_v0 }
  0x3a   : > { %276 = vst.msk [vmem:[#allocation2 + $0x58] sm:$0xff] %vm264_vm0, %v950_v0 }
  0x3b   : > { %277 = vst.msk [vmem:[#allocation2 + $0x60] sm:$0xff] %vm264_vm0, %v950_v0 }
  0x3c   : > { %278 = vst.msk [vmem:[#allocation2 + $0x68] sm:$0xff] %vm264_vm0, %v950_v0 }
  0x3d   : > { %279 = vst.msk [vmem:[#allocation2 + $0x70] sm:$0xff] %vm264_vm0, %v950_v0 }
  0x3e   : > { %280 = vst.msk [vmem:[#allocation2 + $0x78] sm:$0xff] %vm264_vm0, %v950_v0 }
  0x3f PF: > { %v328_v1 = vld [vmem:[%s1067_s14 + $0x78] sm:$0xff]  ;;  %v327_v2 = vld [vmem:[%s1067_s14 + $0x70] sm:$0xff]  ;;  %v326_v3 = vld [vmem:[%s1067_s14 + $0x68] sm:$0xff]  ;;  %vm410_vm1 = vcmask 261120   ;;  %p693_p3 = scmp.ne.s32.totalorder %s929_s18, 1 }
  0x40   : > { %714 = vmatpush.msra.mxu2 %v328_v1  ;;  %715 = vmatpush.msra.mxu3 %v328_v1  ;;  %v325_v4 = vld [vmem:[%s1067_s14 + $0x60] sm:$0xff]  ;;  %v324_v5 = vld [vmem:[%s1067_s14 + $0x58] sm:$0xff]  ;;  %v323_v6 = vld [vmem:[%s1067_s14 + $0x50] sm:$0xff] }
  0x41   : > { %329 = vmatpush.msra.mxu0 %v328_v1  ;;  %713 = vmatpush.msra.mxu1 %v328_v1  ;;  %v322_v7 = vld [vmem:[%s1067_s14 + $0x48] sm:$0xff]  ;;  %v321_v8 = vld [vmem:[%s1067_s14 + $0x40] sm:$0xff]  ;;  %v320_v9 = vld [vmem:[%s1067_s14 + $0x38] sm:$0xff] }
  0x42   : > { %717 = vmatpush.msra.mxu2 %v327_v2  ;;  %718 = vmatpush.msra.mxu3 %v327_v2  ;;  %v319_v10 = vld [vmem:[%s1067_s14 + $0x30] sm:$0xff]  ;;  %v318_v11 = vld [vmem:[%s1067_s14 + $0x28] sm:$0xff]  ;;  %v317_v12 = vld [vmem:[%s1067_s14 + $0x20] sm:$0xff] }
  0x43   : > { %330 = vmatpush.msra.mxu0 %v327_v2  ;;  %716 = vmatpush.msra.mxu1 %v327_v2  ;;  %v316_v13 = vld [vmem:[%s1067_s14 + $0x18] sm:$0xff]  ;;  %v315_v14 = vld [vmem:[%s1067_s14 + $0x10] sm:$0xff]  ;;  %v314_v15 = vld [vmem:[%s1067_s14 + $0x8] sm:$0xff] }
  0x44   : > { %720 = vmatpush.msra.mxu2 %v326_v3  ;;  %721 = vmatpush.msra.mxu3 %v326_v3  ;;  %v313_v16 = vld [vmem:[%s1067_s14] sm:$0xff]  ;;  %v306_v21 = vld [vmem:[%s1056_s11 + $0x48] sm:$0xff]  ;;  %v307_v25 = vld [vmem:[%s1056_s11 + $0x50] sm:$0xff] }
  0x45   : > { %331 = vmatpush.msra.mxu0 %v326_v3  ;;  %719 = vmatpush.msra.mxu1 %v326_v3  ;;  %v305_v17 = vld [vmem:[%s1056_s11 + $0x40] sm:$0xff]  ;;  %v310_v22 = vld [vmem:[%s1056_s11 + $0x68] sm:$0xff]  ;;  %v311_v26 = vld [vmem:[%s1056_s11 + $0x70] sm:$0xff] }
  0x46   : > { %723 = vmatpush.msra.mxu2 %v325_v4  ;;  %724 = vmatpush.msra.mxu3 %v325_v4  ;;  %v309_v18 = vld [vmem:[%s1056_s11 + $0x60] sm:$0xff]  ;;  %v298_v23 = vld [vmem:[%s1056_s11 + $0x8] sm:$0xff]  ;;  %v299_v27 = vld [vmem:[%s1056_s11 + $0x10] sm:$0xff] }
  0x47   : > { %332 = vmatpush.msra.mxu0 %v325_v4  ;;  %722 = vmatpush.msra.mxu1 %v325_v4  ;;  %v297_v19 = vld [vmem:[%s1056_s11] sm:$0xff]  ;;  %v302_v24 = vld [vmem:[%s1056_s11 + $0x28] sm:$0xff]  ;;  %v303_v28 = vld [vmem:[%s1056_s11 + $0x30] sm:$0xff] }
  0x48   : > { %726 = vmatpush.msra.mxu2 %v324_v5  ;;  %727 = vmatpush.msra.mxu3 %v324_v5  ;;  %v301_v20 = vld [vmem:[%s1056_s11 + $0x20] sm:$0xff]  ;;  %v308_v29 = vld [vmem:[%s1056_s11 + $0x58] sm:$0xff]  ;;  %v282_v45 = vld [vmem:[#allocation2 + $0x8] sm:$0xff] }
  0x49   : > { %333 = vmatpush.msra.mxu0 %v324_v5  ;;  %725 = vmatpush.msra.mxu1 %v324_v5  ;;  %v312_v30 = vld [vmem:[%s1056_s11 + $0x78] sm:$0xff]  ;;  %v281_v33 = vld [vmem:[#allocation2] sm:$0xff]  ;;  %v286_v46 = vld [vmem:[#allocation2 + $0x28] sm:$0xff] }
  0x4a   : > { %729 = vmatpush.msra.mxu2 %v323_v6  ;;  %730 = vmatpush.msra.mxu3 %v323_v6  ;;  %v300_v31 = vld [vmem:[%s1056_s11 + $0x18] sm:$0xff]  ;;  %v285_v34 = vld [vmem:[#allocation2 + $0x20] sm:$0xff]  ;;  %v290_v51 = vld [vmem:[#allocation2 + $0x48] sm:$0xff] }
  0x4b   : > { %334 = vmatpush.msra.mxu0 %v323_v6  ;;  %728 = vmatpush.msra.mxu1 %v323_v6  ;;  %v304_v32 = vld [vmem:[%s1056_s11 + $0x38] sm:$0xff]  ;;  %v289_v39 = vld [vmem:[#allocation2 + $0x40] sm:$0xff]  ;;  %v294_v52 = vld [vmem:[#allocation2 + $0x68] sm:$0xff] }
  0x4c   : > { %732 = vmatpush.msra.mxu2 %v322_v7  ;;  %733 = vmatpush.msra.mxu3 %v322_v7  ;;  %v293_v40 = vld [vmem:[#allocation2 + $0x60] sm:$0xff]  ;;  %v283_v57 = vld [vmem:[#allocation2 + $0x10] sm:$0xff]  ;;  %v284_v5 = vld [vmem:[#allocation2 + $0x18] sm:$0xff] }
  0x4d   : > { %335 = vmatpush.msra.mxu0 %v322_v7  ;;  %731 = vmatpush.msra.mxu1 %v322_v7  ;;  %v287_v58 = vld [vmem:[#allocation2 + $0x30] sm:$0xff]  ;;  %v288_v6 = vld [vmem:[#allocation2 + $0x38] sm:$0xff] }
  0x4e   : > { %735 = vmatpush.msra.mxu2 %v321_v8  ;;  %736 = vmatpush.msra.mxu3 %v321_v8  ;;  %v291_v63 = vld [vmem:[#allocation2 + $0x50] sm:$0xff] }
  0x4f   : > { %336 = vmatpush.msra.mxu0 %v321_v8  ;;  %734 = vmatpush.msra.mxu1 %v321_v8  ;;  %v295_v0 = vld [vmem:[#allocation2 + $0x70] sm:$0xff] }
  0x50   : > { %738 = vmatpush.msra.mxu2 %v320_v9  ;;  %739 = vmatpush.msra.mxu3 %v320_v9 }
  0x51   : > { %337 = vmatpush.msra.mxu0 %v320_v9  ;;  %737 = vmatpush.msra.mxu1 %v320_v9 }
  0x52   : > { %741 = vmatpush.msra.mxu2 %v319_v10  ;;  %742 = vmatpush.msra.mxu3 %v319_v10 }
  0x53   : > { %338 = vmatpush.msra.mxu0 %v319_v10  ;;  %740 = vmatpush.msra.mxu1 %v319_v10 }
  0x54   : > { %744 = vmatpush.msra.mxu2 %v318_v11  ;;  %745 = vmatpush.msra.mxu3 %v318_v11 }
  0x55   : > { %339 = vmatpush.msra.mxu0 %v318_v11  ;;  %743 = vmatpush.msra.mxu1 %v318_v11  ;;  %v292_v11 = vld [vmem:[#allocation2 + $0x58] sm:$0xff] }
  0x56   : > { %747 = vmatpush.msra.mxu2 %v317_v12  ;;  %748 = vmatpush.msra.mxu3 %v317_v12 }
  0x57   : > { %340 = vmatpush.msra.mxu0 %v317_v12  ;;  %746 = vmatpush.msra.mxu1 %v317_v12  ;;  %v296_v12 = vld [vmem:[#allocation2 + $0x78] sm:$0xff] }
  0x58   : > { %750 = vmatpush.msra.mxu2 %v316_v13  ;;  %751 = vmatpush.msra.mxu3 %v316_v13 }
  0x59   : > { %341 = vmatpush.msra.mxu0 %v316_v13  ;;  %749 = vmatpush.msra.mxu1 %v316_v13 }
  0x5a   : > { %753 = vmatpush.msra.mxu2 %v315_v14  ;;  %754 = vmatpush.msra.mxu3 %v315_v14 }
  0x5b   : > { %342 = vmatpush.msra.mxu0 %v315_v14  ;;  %752 = vmatpush.msra.mxu1 %v315_v14 }
  0x5c   : > { %756 = vmatpush.msra.mxu2 %v314_v15  ;;  %757 = vmatpush.msra.mxu3 %v314_v15 }
  0x5d   : > { %343 = vmatpush.msra.mxu0 %v314_v15  ;;  %755 = vmatpush.msra.mxu1 %v314_v15 }
  0x5e   : > { %759 = vmatpush.msra.mxu2 %v313_v16  ;;  %760 = vmatpush.msra.mxu3 %v313_v16 }
  0x5f   : > { %369 = vmatmul.f32.vlgmr.msra.gmra.mxu2 %v305_v17  ;;  %381 = vmatmul.f32.vlgmr.msra.gmra.mxu3 %v309_v18 }
  0x60   : > { %344 = vmatpush.msra.mxu0 %v313_v16  ;;  %758 = vmatpush.msra.mxu1 %v313_v16 }
  0x61   : > { %345 = vmatmul.f32.vlgmr.msra.gmra.mxu0 %v297_v19  ;;  %357 = vmatmul.f32.vlgmr.msra.gmra.mxu1 %v301_v20 }
  0x67   : > { %372 = vmatmul.f32.gmra.mxu2 %v306_v21  ;;  %384 = vmatmul.f32.gmra.mxu3 %v310_v22 }
  0x69   : > { %348 = vmatmul.f32.gmra.mxu0 %v298_v23  ;;  %360 = vmatmul.f32.gmra.mxu1 %v302_v24 }
  0x6f   : > { %375 = vmatmul.f32.gmra.mxu2 %v307_v25  ;;  %387 = vmatmul.f32.gmra.mxu3 %v311_v26 }
  0x71   : > { %351 = vmatmul.f32.gmra.mxu0 %v299_v27  ;;  %363 = vmatmul.f32.gmra.mxu1 %v303_v28 }
  0x77   : > { %378 = vmatmul.f32.gmra.mxu2 %v308_v29  ;;  %390 = vmatmul.f32.gmra.mxu3 %v312_v30 }
  0x79   : > { %354 = vmatmul.f32.gmra.mxu0 %v300_v31  ;;  %366 = vmatmul.f32.gmra.mxu1 %v304_v32 }
  0xde   : > { %v346_v35 = vpop.f32.mrf.mxu0  ;;  %v358_v36 = vpop.f32.mrf.mxu1 }
  0xdf   : > { %v394_v37 = vadd.f32 %v346_v35, %v281_v33  ;;  %v398_v38 = vadd.f32 %v358_v36, %v285_v34 }
  0xe1   : > { %411 = vst.msk [vmem:[#allocation2] sm:$0xff] %vm410_vm1, %v394_v37 }
  0xe2   : > { %415 = vst.msk [vmem:[#allocation2 + $0x20] sm:$0xff] %vm410_vm1, %v398_v38  ;;  %v370_v41 = vpop.f32.mrf.mxu2  ;;  %v382_v42 = vpop.f32.mrf.mxu3 }
  0xe3   : > { %v402_v43 = vadd.f32 %v370_v41, %v289_v39  ;;  %v406_v44 = vadd.f32 %v382_v42, %v293_v40 }
  0xe5   : > { %419 = vst.msk [vmem:[#allocation2 + $0x40] sm:$0xff] %vm410_vm1, %v402_v43 }
  0xe6   : > { %423 = vst.msk [vmem:[#allocation2 + $0x60] sm:$0xff] %vm410_vm1, %v406_v44  ;;  %v349_v47 = vpop.f32.mrf.mxu0  ;;  %v361_v48 = vpop.f32.mrf.mxu1 }
  0xe7   : > { %v395_v49 = vadd.f32 %v349_v47, %v282_v45  ;;  %v399_v50 = vadd.f32 %v361_v48, %v286_v46 }
  0xe9   : > { %412 = vst.msk [vmem:[#allocation2 + $0x8] sm:$0xff] %vm410_vm1, %v395_v49 }
  0xea   : > { %416 = vst.msk [vmem:[#allocation2 + $0x28] sm:$0xff] %vm410_vm1, %v399_v50  ;;  %v373_v53 = vpop.f32.mrf.mxu2  ;;  %v385_v54 = vpop.f32.mrf.mxu3 }
  0xeb   : > { %v403_v55 = vadd.f32 %v373_v53, %v290_v51  ;;  %v407_v56 = vadd.f32 %v385_v54, %v294_v52 }
  0xed   : > { %420 = vst.msk [vmem:[#allocation2 + $0x48] sm:$0xff] %vm410_vm1, %v403_v55 }
  0xee   : > { %424 = vst.msk [vmem:[#allocation2 + $0x68] sm:$0xff] %vm410_vm1, %v407_v56  ;;  %v352_v59 = vpop.f32.mrf.mxu0  ;;  %v364_v60 = vpop.f32.mrf.mxu1 }
  0xef   : > { %v396_v61 = vadd.f32 %v352_v59, %v283_v57  ;;  %v400_v62 = vadd.f32 %v364_v60, %v287_v58 }
  0xf1   : > { %413 = vst.msk [vmem:[#allocation2 + $0x10] sm:$0xff] %vm410_vm1, %v396_v61 }
  0xf2   : > { %417 = vst.msk [vmem:[#allocation2 + $0x30] sm:$0xff] %vm410_vm1, %v400_v62  ;;  %v376_v1 = vpop.f32.mrf.mxu2  ;;  %v388_v2 = vpop.f32.mrf.mxu3 }
  0xf3   : > { %v404_v3 = vadd.f32 %v376_v1, %v291_v63  ;;  %v408_v4 = vadd.f32 %v388_v2, %v295_v0 }
  0xf5   : > { %421 = vst.msk [vmem:[#allocation2 + $0x50] sm:$0xff] %vm410_vm1, %v404_v3 }
  0xf6   : > { %425 = vst.msk [vmem:[#allocation2 + $0x70] sm:$0xff] %vm410_vm1, %v408_v4  ;;  %v355_v7 = vpop.f32.mrf.mxu0  ;;  %v367_v8 = vpop.f32.mrf.mxu1 }
  0xf7   : > { %v397_v9 = vadd.f32 %v355_v7, %v284_v5  ;;  %v401_v10 = vadd.f32 %v367_v8, %v288_v6 }
  0xf9   : > { %414 = vst.msk [vmem:[#allocation2 + $0x18] sm:$0xff] %vm410_vm1, %v397_v9 }
  0xfa   : > { %418 = vst.msk [vmem:[#allocation2 + $0x38] sm:$0xff] %vm410_vm1, %v401_v10  ;;  %v379_v13 = vpop.f32.mrf.mxu2  ;;  %v391_v14 = vpop.f32.mrf.mxu3  ;;  %430 = sbr.rel (%p693_p3) target bundleno = 423 (0x1a7), region = 48 }
  0xfb   : > { %v405_v15 = vadd.f32 %v379_v13, %v292_v11  ;;  %v409_v16 = vadd.f32 %v391_v14, %v296_v12 }
  0xfd   : > { %422 = vst.msk [vmem:[#allocation2 + $0x58] sm:$0xff] %vm410_vm1, %v405_v15 }
  0xfe   : > { %426 = vst.msk [vmem:[#allocation2 + $0x78] sm:$0xff] %vm410_vm1, %v409_v16 }
  0xff   : > { %v450_v17 = vld [vmem:[%s1229_s2 + $0x18] sm:$0xff]  ;;  %v449_v18 = vld [vmem:[%s1229_s2 + $0x10] sm:$0xff]  ;;  %v448_v19 = vld [vmem:[%s1229_s2 + $0x8] sm:$0xff]  ;;  %vm568_vm2 = vcmask 523264  }
 0x100   : > { %762 = vmatpush.msra.mxu2 %v450_v17  ;;  %763 = vmatpush.msra.mxu3 %v450_v17  ;;  %v447_v20 = vld [vmem:[%s1229_s2] sm:$0xff]  ;;  %v440_v25 = vld [vmem:[#allocation2 + $0x48] sm:$0xff]  ;;  %v441_v29 = vld [vmem:[#allocation2 + $0x50] sm:$0xff] }
 0x101   : > { %515 = vmatpush.msra.mxu0 %v450_v17  ;;  %761 = vmatpush.msra.mxu1 %v450_v17  ;;  %v439_v21 = vld [vmem:[#allocation2 + $0x40] sm:$0xff]  ;;  %v444_v26 = vld [vmem:[#allocation2 + $0x68] sm:$0xff]  ;;  %v445_v30 = vld [vmem:[#allocation2 + $0x70] sm:$0xff] }
 0x102   : > { %765 = vmatpush.msra.mxu2 %v449_v18  ;;  %766 = vmatpush.msra.mxu3 %v449_v18  ;;  %v443_v22 = vld [vmem:[#allocation2 + $0x60] sm:$0xff]  ;;  %v432_v27 = vld [vmem:[#allocation2 + $0x8] sm:$0xff]  ;;  %v433_v31 = vld [vmem:[#allocation2 + $0x10] sm:$0xff] }
 0x103   : > { %516 = vmatpush.msra.mxu0 %v449_v18  ;;  %764 = vmatpush.msra.mxu1 %v449_v18  ;;  %v431_v23 = vld [vmem:[#allocation2] sm:$0xff]  ;;  %v436_v28 = vld [vmem:[#allocation2 + $0x28] sm:$0xff]  ;;  %v437_v32 = vld [vmem:[#allocation2 + $0x30] sm:$0xff] }
 0x104   : > { %768 = vmatpush.msra.mxu2 %v448_v19  ;;  %769 = vmatpush.msra.mxu3 %v448_v19  ;;  %v435_v24 = vld [vmem:[#allocation2 + $0x20] sm:$0xff]  ;;  %v442_v33 = vld [vmem:[#allocation2 + $0x58] sm:$0xff] }
 0x105   : > { %517 = vmatpush.msra.mxu0 %v448_v19  ;;  %767 = vmatpush.msra.mxu1 %v448_v19  ;;  %v446_v34 = vld [vmem:[#allocation2 + $0x78] sm:$0xff]  ;;  %v848_v37 = vld [vmem:[%s1230_s3] ss:$0 sm:$0xff] }
 0x106   : > { %771 = vmatpush.msra.mxu2 %v447_v20  ;;  %772 = vmatpush.msra.mxu3 %v447_v20  ;;  %v434_v35 = vld [vmem:[#allocation2 + $0x18] sm:$0xff] }
 0x107   : > { %702 = vmatmul.msk.f32.vlgmr.msra.gmra.mxu2 %vm410_vm1, %v439_v21  ;;  %706 = vmatmul.msk.f32.vlgmr.msra.gmra.mxu3 %vm410_vm1, %v443_v22  ;;  %v438_v36 = vld [vmem:[#allocation2 + $0x38] sm:$0xff] }
 0x108   : > { %518 = vmatpush.msra.mxu0 %v447_v20  ;;  %770 = vmatpush.msra.mxu1 %v447_v20 }
 0x109   : > { %694 = vmatmul.msk.f32.vlgmr.msra.gmra.mxu0 %vm410_vm1, %v431_v23  ;;  %698 = vmatmul.msk.f32.vlgmr.msra.gmra.mxu1 %vm410_vm1, %v435_v24 }
 0x10f   : > { %703 = vmatmul.msk.f32.gmra.mxu2 %vm410_vm1, %v440_v25  ;;  %707 = vmatmul.msk.f32.gmra.mxu3 %vm410_vm1, %v444_v26 }
 0x111   : > { %695 = vmatmul.msk.f32.gmra.mxu0 %vm410_vm1, %v432_v27  ;;  %699 = vmatmul.msk.f32.gmra.mxu1 %vm410_vm1, %v436_v28 }
 0x117   : > { %704 = vmatmul.msk.f32.gmra.mxu2 %vm410_vm1, %v441_v29  ;;  %708 = vmatmul.msk.f32.gmra.mxu3 %vm410_vm1, %v445_v30 }
 0x119   : > { %696 = vmatmul.msk.f32.gmra.mxu0 %vm410_vm1, %v433_v31  ;;  %700 = vmatmul.msk.f32.gmra.mxu1 %vm410_vm1, %v437_v32 }
 0x11f   : > { %705 = vmatmul.msk.f32.gmra.mxu2 %vm410_vm1, %v442_v33  ;;  %709 = vmatmul.msk.f32.gmra.mxu3 %vm410_vm1, %v446_v34 }
 0x121   : > { %697 = vmatmul.msk.f32.gmra.mxu0 %vm410_vm1, %v434_v35  ;;  %701 = vmatmul.msk.f32.gmra.mxu1 %vm410_vm1, %v438_v36 }
 0x186   : > { %v520_v38 = vpop.f32.mrf.mxu0  ;;  %v532_v39 = vpop.f32.mrf.mxu1 }
 0x187   : > { %v521_v40 = vadd.f32 %v848_v37, %v520_v38  ;;  %v533_v41 = vadd.f32 %v848_v37, %v532_v39 }
 0x189   : > { %569 = vst.msk [vmem:[%s1072_s29] sm:$0xff] %vm568_vm2, %v521_v40 }
 0x18a   : > { %573 = vst.msk [vmem:[%s1072_s29 + $0x20] sm:$0xff] %vm568_vm2, %v533_v41  ;;  %v544_v42 = vpop.f32.mrf.mxu2  ;;  %v556_v43 = vpop.f32.mrf.mxu3 }
 0x18b   : > { %v545_v44 = vadd.f32 %v848_v37, %v544_v42  ;;  %v557_v45 = vadd.f32 %v848_v37, %v556_v43 }
 0x18d   : > { %577 = vst.msk [vmem:[%s1072_s29 + $0x40] sm:$0xff] %vm568_vm2, %v545_v44 }
 0x18e   : > { %581 = vst.msk [vmem:[%s1072_s29 + $0x60] sm:$0xff] %vm568_vm2, %v557_v45  ;;  %v523_v46 = vpop.f32.mrf.mxu0  ;;  %v535_v47 = vpop.f32.mrf.mxu1 }
 0x18f   : > { %v524_v48 = vadd.f32 %v848_v37, %v523_v46  ;;  %v536_v49 = vadd.f32 %v848_v37, %v535_v47 }
 0x191   : > { %570 = vst.msk [vmem:[%s1072_s29 + $0x8] sm:$0xff] %vm568_vm2, %v524_v48 }
 0x192   : > { %574 = vst.msk [vmem:[%s1072_s29 + $0x28] sm:$0xff] %vm568_vm2, %v536_v49  ;;  %v547_v50 = vpop.f32.mrf.mxu2  ;;  %v559_v51 = vpop.f32.mrf.mxu3 }
 0x193   : > { %v548_v52 = vadd.f32 %v848_v37, %v547_v50  ;;  %v560_v53 = vadd.f32 %v848_v37, %v559_v51 }
 0x195   : > { %578 = vst.msk [vmem:[%s1072_s29 + $0x48] sm:$0xff] %vm568_vm2, %v548_v52 }
 0x196   : > { %582 = vst.msk [vmem:[%s1072_s29 + $0x68] sm:$0xff] %vm568_vm2, %v560_v53  ;;  %v526_v54 = vpop.f32.mrf.mxu0  ;;  %v538_v55 = vpop.f32.mrf.mxu1 }
 0x197   : > { %v527_v56 = vadd.f32 %v848_v37, %v526_v54  ;;  %v539_v57 = vadd.f32 %v848_v37, %v538_v55 }
 0x199   : > { %571 = vst.msk [vmem:[%s1072_s29 + $0x10] sm:$0xff] %vm568_vm2, %v527_v56 }
 0x19a   : > { %575 = vst.msk [vmem:[%s1072_s29 + $0x30] sm:$0xff] %vm568_vm2, %v539_v57  ;;  %v550_v58 = vpop.f32.mrf.mxu2  ;;  %v562_v59 = vpop.f32.mrf.mxu3 }
 0x19b   : > { %v551_v60 = vadd.f32 %v848_v37, %v550_v58  ;;  %v563_v61 = vadd.f32 %v848_v37, %v562_v59 }
 0x19d   : > { %579 = vst.msk [vmem:[%s1072_s29 + $0x50] sm:$0xff] %vm568_vm2, %v551_v60 }
 0x19e   : > { %583 = vst.msk [vmem:[%s1072_s29 + $0x70] sm:$0xff] %vm568_vm2, %v563_v61  ;;  %v529_v62 = vpop.f32.mrf.mxu0  ;;  %v541_v63 = vpop.f32.mrf.mxu1 }
 0x19f   : > { %v530_v0 = vadd.f32 %v848_v37, %v529_v62  ;;  %v542_v1 = vadd.f32 %v848_v37, %v541_v63 }
 0x1a1   : > { %572 = vst.msk [vmem:[%s1072_s29 + $0x18] sm:$0xff] %vm568_vm2, %v530_v0 }
 0x1a2   : > { %576 = vst.msk [vmem:[%s1072_s29 + $0x38] sm:$0xff] %vm568_vm2, %v542_v1  ;;  %v553_v2 = vpop.f32.mrf.mxu2  ;;  %v565_v3 = vpop.f32.mrf.mxu3 }
 0x1a3   : > { %v554_v4 = vadd.f32 %v848_v37, %v553_v2  ;;  %v566_v5 = vadd.f32 %v848_v37, %v565_v3 }
 0x1a5   : > { %580 = vst.msk [vmem:[%s1072_s29 + $0x58] sm:$0xff] %vm568_vm2, %v554_v4 }
 0x1a6   : > { %584 = vst.msk [vmem:[%s1072_s29 + $0x78] sm:$0xff] %vm568_vm2, %v566_v5 }
 0x1a7 PF: > { %s17_s22 = sadd.s32 1, %s945_s22   ;;  %s1236_s6 = sld [smem:[#allocation6_spill]] }
 0x1a8   : > { %p14_p4 = scmp.ge.s32.totalorder %s17_s22, 6   ;;  %s1237_s15 = smov %s921_s16 }
 0x1a9   : > { %s1238_s16 = smov %s925_s17  ;;  %s1239_s17 = smov %s1043_s9 }
 0x1aa   : > { %s1240_s18 = smov %s937_s20  ;;  %s1241_s19 = smov %s941_s21 }
 0x1ab   : > { %s1242_s20 = smov %s1245_s24  ;;  %16 = sbr.rel (!%p14_p4) target bundleno = 5 (0x5), region = 87 }
 0x1ad   : > { %s1243_s21 = smov %s1236_s6 }
 0x1b0   :  { %607 = vsyncpa [#allocation4], 1 }
 0x1b1   :  { %609 = vsyncpa [#allocation4 + $0x1], 1 }

</bundles_post_ra>
